<compile_context>
chip_gen: v5e
topology: v5e:2x2
jax: 0.10.0
libtpu: 0.0.40
codegen_flags: <defaults>
</compile_context>

<pallas_src>
import functools

import jax
import jax.numpy as jnp
from jax import lax
from jax.experimental import pallas as pl
from jax.experimental.pallas import tpu as pltpu


def _round_up(x, m):
    return ((x + m - 1) // m) * m


def _sage_conv_kernel(adj_ref, h_src_ref, h_self_ref, w_self_ref, w_neigh_ref,
                      b_ref, o_ref, acc_ref):
    k = pl.program_id(1)

    @pl.when(k == 0)
    def _():
        acc_ref[...] = jnp.zeros_like(acc_ref)

    # Neighbor aggregation for this (dst-tile, src-tile) pair on the MXU.
    # adj is stored bf16 (0/1 exact); cast to f32 for an exact f32 accumulate.
    # h_src has a trailing ones column, so acc[:, -1] accumulates the in-degree
    # for free in the same matmul.
    adj = adj_ref[...].astype(jnp.float32)                       # [TM, TK]
    acc_ref[...] += jnp.dot(adj, h_src_ref[...],
                            preferred_element_type=jnp.float32)   # [TM, F_in+1]

    # Finalize only on the last src-tile: mean-normalize using the in-kernel
    # degree, then two matmuls (self path + neighbor path, no concatenate),
    # bias add, store.
    @pl.when(k == pl.num_programs(1) - 1)
    def _():
        acc = acc_ref[...]
        fa = acc.shape[-1]
        deg = acc[:, fa - 1:fa]                                   # [TM, 1]
        inv_deg = 1.0 / jnp.maximum(deg, 1.0)
        # The last column of h_n is garbage (deg * inv_deg) but W_neigh's last
        # row is zero, so it contributes nothing to the output.
        h_n = acc * inv_deg                                       # [TM, F_in+1]
        out = jnp.dot(h_self_ref[...], w_self_ref[...],
                      preferred_element_type=jnp.float32)
        out = out + jnp.dot(h_n, w_neigh_ref[...],
                            preferred_element_type=jnp.float32)
        out = out + b_ref[...]
        o_ref[...] = out.astype(o_ref.dtype)


@functools.partial(jax.jit, static_argnames=("tm", "tk"))
def sage_conv(adj, h, w, b, *, tm=512, tk=2048):
    """adj: [N, N] f32 (adj[dst, src] = 1 for edge src->dst), h: [N, F_in] f32,
    w: [2*F_in, F_out] f32 (transposed vs. nn.Linear), b: [1, F_out] f32."""
    n, f_in = h.shape
    f_out = w.shape[1]
    fa = f_in + 1                      # h augmented with a ones column (degree)
    f_out_p = _round_up(f_out, 128)    # lane-dense output

    # ---- static tile selection -------------------------------------------
    n_128 = _round_up(n, 128)
    tm = max(128, min(tm, n_128))
    tk = min(tk, n_128)
    tk = max(tm, _round_up(tk, tm))    # keep tm | tk -> no lcm padding blowup

    def _footprint(tm_, tk_):
        # double-buffered inputs/outputs + f32 cast temp + accumulator scratch
        return (2 * (tm_ * tk_ * 2            # adj bf16
                     + tk_ * fa * 4           # h_src
                     + tm_ * fa * 4           # h_self
                     + tm_ * f_out_p * 4      # output
                     + 2 * fa * f_out_p * 4   # W_self + W_neigh
                     + f_out_p * 4)           # bias
                + tm_ * tk_ * 4               # per-tile f32 cast of adj
                + tm_ * fa * 4)               # accumulator scratch

    budget = 12 * 1024 * 1024          # headroom under v5e's 16 MiB scoped VMEM
    while _footprint(tm, tk) > budget and tk > tm:
        tk = max(tm, _round_up(tk // 2, tm))
    while _footprint(tm, tk) > budget and tm > 128:
        tm //= 2

    n_p = _round_up(n, tk)             # tm | tk | n_p
    # Keep the dst axis shardable across 2 TensorCores (v7x) when possible.
    while n_p // tm < 2 and tm > 128:
        tm //= 2

    grid = (n_p // tm, n_p // tk)

    # ---- padded / augmented operands (fused under jit) --------------------
    adj_p = jnp.pad(adj.astype(jnp.bfloat16),
                    ((0, n_p - n), (0, n_p - n)))                  # [N_p, N_p]
    h_aug = jnp.concatenate(
        [h.astype(jnp.float32), jnp.ones((n, 1), jnp.float32)], axis=1)
    h_aug_p = jnp.pad(h_aug, ((0, n_p - n), (0, 0)))               # [N_p, F_in+1]

    # Split the linear weight so the kernel never concatenates along lanes.
    # One extra zero row absorbs the ones/degree column of the augmented h.
    w_self_p = jnp.pad(w[:f_in, :].astype(jnp.float32),
                       ((0, 1), (0, f_out_p - f_out)))             # [F_in+1, F_out_p]
    w_neigh_p = jnp.pad(w[f_in:, :].astype(jnp.float32),
                        ((0, 1), (0, f_out_p - f_out)))            # [F_in+1, F_out_p]
    b_p = jnp.pad(b.astype(jnp.float32), ((0, 0), (0, f_out_p - f_out)))

    out_p = pl.pallas_call(
        _sage_conv_kernel,
        out_shape=jax.ShapeDtypeStruct((n_p, f_out_p), jnp.float32),
        grid_spec=pltpu.PrefetchScalarGridSpec(
            num_scalar_prefetch=0,
            grid=grid,
            in_specs=[
                pl.BlockSpec((tm, tk), lambda i, k: (i, k)),           # adj tile
                pl.BlockSpec((tk, fa), lambda i, k: (k, 0)),           # h (src rows, +ones)
                pl.BlockSpec((tm, fa), lambda i, k: (i, 0)),           # h (self rows, +ones)
                pl.BlockSpec((fa, f_out_p), lambda i, k: (0, 0)),      # W_self (+zero row)
                pl.BlockSpec((fa, f_out_p), lambda i, k: (0, 0)),      # W_neigh (+zero row)
                pl.BlockSpec((1, f_out_p), lambda i, k: (0, 0)),       # bias
            ],
            out_specs=pl.BlockSpec((tm, f_out_p), lambda i, k: (i, 0)),
            scratch_shapes=[pltpu.VMEM((tm, fa), jnp.float32)],        # agg + degree acc
        ),
        compiler_params=pltpu.CompilerParams(
            dimension_semantics=("parallel", "arbitrary"),
        ),
    )(adj_p, h_aug_p, h_aug_p, w_self_p, w_neigh_p, b_p)

    return out_p[:n, :f_out]


def sage_conv_ref(adj, h, w, b):
    agg = jnp.dot(adj, h, precision=lax.Precision.HIGHEST)
    deg = adj.sum(axis=1, keepdims=True)
    h_n = agg / jnp.maximum(deg, 1.0)
    h_total = jnp.concatenate([h, h_n], axis=1)
    return jnp.dot(h_total, w, precision=lax.Precision.HIGHEST) + b


def _make_case(key, n, f_in, f_out):
    k_edge, k_h, k_w, k_b = jax.random.split(key, 4)
    adj = (jax.random.uniform(k_edge, (n, n)) < 0.05).astype(jnp.float32)
    adj = adj * (1.0 - jnp.eye(n, dtype=jnp.float32))   # no self loops
    h = jax.random.normal(k_h, (n, f_in), dtype=jnp.float32)
    bound = 1.0 / jnp.sqrt(2.0 * f_in)
    w = jax.random.uniform(k_w, (2 * f_in, f_out), minval=-bound, maxval=bound,
                           dtype=jnp.float32)
    b = jax.random.uniform(k_b, (1, f_out), minval=-bound, maxval=bound,
                           dtype=jnp.float32)
    return adj, h, w, b


if __name__ == "__main__":
    key = jax.random.PRNGKey(0)
    k1, k2 = jax.random.split(key)

    # Case 1: aligned small graph.
    adj, h, w, b = _make_case(k1, 256, 32, 64)
    out = sage_conv(adj, h, w, b)
    jax.block_until_ready(out)
    ref = sage_conv_ref(adj, h, w, b)
    assert out.shape == (256, 64)
    assert jnp.allclose(out, ref, atol=1e-3, rtol=1e-3), \
        float(jnp.max(jnp.abs(out - ref)))

    # Case 2: non-128-aligned sizes exercise the padding / slicing paths.
    adj2, h2, w2, b2 = _make_case(k2, 200, 16, 24)
    out2 = sage_conv(adj2, h2, w2, b2)
    jax.block_until_ready(out2)
    ref2 = sage_conv_ref(adj2, h2, w2, b2)
    assert out2.shape == (200, 24)
    assert jnp.allclose(out2, ref2, atol=1e-3, rtol=1e-3), \
        float(jnp.max(jnp.abs(out2 - ref2)))

    print("KERNEL_OK")
</pallas_src>

<mosaic_0001>
module attributes {stable_mosaic.version = 11 : i64} {
  func.func @_sage_conv_kernel(%arg0: i32, %arg1: i32, %arg2: memref<128x256xbf16, #tpu.memory_space<vmem>>, %arg3: memref<256x33xf32, #tpu.memory_space<vmem>>, %arg4: memref<128x33xf32, #tpu.memory_space<vmem>>, %arg5: memref<33x128xf32, #tpu.memory_space<vmem>>, %arg6: memref<33x128xf32, #tpu.memory_space<vmem>>, %arg7: memref<1x128xf32, #tpu.memory_space<vmem>>, %arg8: memref<128x128xf32, #tpu.memory_space<vmem>>, %arg9: memref<128x33xf32, #tpu.memory_space<vmem>>) attributes {dimension_semantics = [#tpu.dimension_semantics<parallel>, #tpu.dimension_semantics<arbitrary>], iteration_bounds = array<i64: 2, 1>, scalar_prefetch = 0 : i64, scratch_operands = 1 : i64, tpu.core_type = #tpu.core_type<tc>, window_params = [{transform_indices = @transform_0, window_bounds = array<i64: 128, 256>}, {transform_indices = @transform_1, window_bounds = array<i64: 256, 33>}, {transform_indices = @transform_2, window_bounds = array<i64: 128, 33>}, {pipeline_mode = #tpu.pipeline_mode<synchronous>, transform_indices = @transform_3, window_bounds = array<i64: 33, 128>}, {pipeline_mode = #tpu.pipeline_mode<synchronous>, transform_indices = @transform_4, window_bounds = array<i64: 33, 128>}, {pipeline_mode = #tpu.pipeline_mode<synchronous>, transform_indices = @transform_5, window_bounds = array<i64: 1, 128>}, {transform_indices = @transform_6, window_bounds = array<i64: 128, 128>}]} {
    %c0_i32 = arith.constant 0 : i32
    %0 = arith.cmpi eq, %arg1, %c0_i32 : i32
    %1 = arith.extui %0 : i1 to i32
    %c0_i32_0 = arith.constant 0 : i32
    %2 = arith.cmpi ne, %1, %c0_i32_0 : i32
    scf.if %2 {
      %cst_10 = arith.constant 0.000000e+00 : f32
      %13 = vector.broadcast %cst_10 : f32 to vector<128x33xf32>
      %c0_11 = arith.constant 0 : index
      %c0_12 = arith.constant 0 : index
      %14 = vector.load %arg9[%c0_11, %c0_12] : memref<128x33xf32, #tpu.memory_space<vmem>>, vector<128x33xf32>
      tpu.vector_store %arg9[%c0_11, %c0_12], %13 {strides = array<i32>} : memref<128x33xf32, #tpu.memory_space<vmem>>, vector<128x33xf32>,
    } else {
    }
    %c0 = arith.constant 0 : index
    %c0_1 = arith.constant 0 : index
    %3 = vector.load %arg2[%c0, %c0_1] : memref<128x256xbf16, #tpu.memory_space<vmem>>, vector<128x256xbf16>
    %4 = arith.extf %3 : vector<128x256xbf16> to vector<128x256xf32>
    %c0_2 = arith.constant 0 : index
    %c0_3 = arith.constant 0 : index
    %5 = vector.load %arg9[%c0_2, %c0_3] : memref<128x33xf32, #tpu.memory_space<vmem>>, vector<128x33xf32>
    %c0_4 = arith.constant 0 : index
    %c0_5 = arith.constant 0 : index
    %6 = vector.load %arg3[%c0_4, %c0_5] : memref<256x33xf32, #tpu.memory_space<vmem>>, vector<256x33xf32>
    %cst = arith.constant dense<0.000000e+00> : vector<128x33xf32>
    %7 = tpu.matmul %4, %6, %cst {dimension_numbers = #tpu.dot_dimension_numbers<[1], [0], [0], [1], [0, 0, 1, 1], [], []>} : vector<128x256xf32>, vector<256x33xf32>, vector<128x33xf32> -> vector<128x33xf32>
    %8 = arith.addf %5, %7 : vector<128x33xf32>
    %c0_6 = arith.constant 0 : index
    %c0_7 = arith.constant 0 : index
    %9 = vector.load %arg9[%c0_6, %c0_7] : memref<128x33xf32, #tpu.memory_space<vmem>>, vector<128x33xf32>
    tpu.vector_store %arg9[%c0_6, %c0_7], %8 {strides = array<i32>} : memref<128x33xf32, #tpu.memory_space<vmem>>, vector<128x33xf32>,
    %c0_i32_8 = arith.constant 0 : i32
    %10 = arith.cmpi eq, %arg1, %c0_i32_8 : i32
    %11 = arith.extui %10 : i1 to i32
    %c0_i32_9 = arith.constant 0 : i32
    %12 = arith.cmpi ne, %11, %c0_i32_9 : i32
    scf.if %12 {
      %c0_10 = arith.constant 0 : index
      %c0_11 = arith.constant 0 : index
      %13 = vector.load %arg9[%c0_10, %c0_11] : memref<128x33xf32, #tpu.memory_space<vmem>>, vector<128x33xf32>
      %14 = vector.extract_strided_slice %13 {offsets = [0, 32], sizes = [128, 1], strides = [1, 1]} : vector<128x33xf32> to vector<128x1xf32>
      %cst_12 = arith.constant 1.000000e+00 : f32
      %15 = vector.broadcast %cst_12 : f32 to vector<128x1xf32>
      %16 = arith.maximumf %14, %15 : vector<128x1xf32>
      %cst_13 = arith.constant 1.000000e+00 : f32
      %17 = vector.broadcast %cst_13 : f32 to vector<128x1xf32>
      %18 = arith.divf %17, %16 : vector<128x1xf32>
      %19 = vector.broadcast %18 : vector<128x1xf32> to vector<128x33xf32>
      %20 = arith.mulf %13, %19 : vector<128x33xf32>
      %c0_14 = arith.constant 0 : index
      %c0_15 = arith.constant 0 : index
      %21 = vector.load %arg4[%c0_14, %c0_15] : memref<128x33xf32, #tpu.memory_space<vmem>>, vector<128x33xf32>
      %c0_16 = arith.constant 0 : index
      %c0_17 = arith.constant 0 : index
      %22 = vector.load %arg5[%c0_16, %c0_17] : memref<33x128xf32, #tpu.memory_space<vmem>>, vector<33x128xf32>
      %cst_18 = arith.constant dense<0.000000e+00> : vector<128x128xf32>
      %23 = tpu.matmul %21, %22, %cst_18 {dimension_numbers = #tpu.dot_dimension_numbers<[1], [0], [0], [1], [0, 0, 1, 1], [], []>} : vector<128x33xf32>, vector<33x128xf32>, vector<128x128xf32> -> vector<128x128xf32>
      %c0_19 = arith.constant 0 : index
      %c0_20 = arith.constant 0 : index
      %24 = vector.load %arg6[%c0_19, %c0_20] : memref<33x128xf32, #tpu.memory_space<vmem>>, vector<33x128xf32>
      %cst_21 = arith.constant dense<0.000000e+00> : vector<128x128xf32>
      %25 = tpu.matmul %20, %24, %cst_21 {dimension_numbers = #tpu.dot_dimension_numbers<[1], [0], [0], [1], [0, 0, 1, 1], [], []>} : vector<128x33xf32>, vector<33x128xf32>, vector<128x128xf32> -> vector<128x128xf32>
      %26 = arith.addf %23, %25 : vector<128x128xf32>
      %c0_22 = arith.constant 0 : index
      %c0_23 = arith.constant 0 : index
      %27 = vector.load %arg7[%c0_22, %c0_23] : memref<1x128xf32, #tpu.memory_space<vmem>>, vector<1x128xf32>
      %28 = vector.broadcast %27 : vector<1x128xf32> to vector<128x128xf32>
      %29 = arith.addf %26, %28 : vector<128x128xf32>
      %c0_24 = arith.constant 0 : index
      %c0_25 = arith.constant 0 : index
      %30 = vector.load %arg8[%c0_24, %c0_25] : memref<128x128xf32, #tpu.memory_space<vmem>>, vector<128x128xf32>
      tpu.vector_store %arg8[%c0_24, %c0_25], %29 {strides = array<i32>} : memref<128x128xf32, #tpu.memory_space<vmem>>, vector<128x128xf32>,
    } else {
    }
    return
  }
  func.func @transform_0(%arg0: i32, %arg1: i32) -> (i32, i32) {
    %c0_i32 = arith.constant 0 : i32
    return %arg0, %arg1 : i32, i32
  }
  func.func @transform_1(%arg0: i32, %arg1: i32) -> (i32, i32) {
    %c0_i32 = arith.constant 0 : i32
    %c0_i32_0 = arith.constant 0 : i32
    return %arg1, %c0_i32 : i32, i32
  }
  func.func @transform_2(%arg0: i32, %arg1: i32) -> (i32, i32) {
    %c0_i32 = arith.constant 0 : i32
    %c0_i32_0 = arith.constant 0 : i32
    return %arg0, %c0_i32 : i32, i32
  }
  func.func @transform_3(%arg0: i32, %arg1: i32) -> (i32, i32) {
    %c0_i32 = arith.constant 0 : i32
    %c0_i32_0 = arith.constant 0 : i32
    %c0_i32_1 = arith.constant 0 : i32
    return %c0_i32, %c0_i32_0 : i32, i32
  }
  func.func @transform_4(%arg0: i32, %arg1: i32) -> (i32, i32) {
    %c0_i32 = arith.constant 0 : i32
    %c0_i32_0 = arith.constant 0 : i32
    %c0_i32_1 = arith.constant 0 : i32
    return %c0_i32, %c0_i32_0 : i32, i32
  }
  func.func @transform_5(%arg0: i32, %arg1: i32) -> (i32, i32) {
    %c0_i32 = arith.constant 0 : i32
    %c0_i32_0 = arith.constant 0 : i32
    %c0_i32_1 = arith.constant 0 : i32
    return %c0_i32, %c0_i32_0 : i32, i32
  }
  func.func @transform_6(%arg0: i32, %arg1: i32) -> (i32, i32) {
    %c0_i32 = arith.constant 0 : i32
    %c0_i32_0 = arith.constant 0 : i32
    return %arg0, %c0_i32 : i32, i32
  }
}

</mosaic_0001>

<bundles_post_ra>
// kernel: sage_conv.1
= control target key start
LH: loop header
LB: loop body
LE: loop exit
PB: predicated region body
PF: predicated region fallthrough
CT: control target
= control target key end

     0   :  { %s1547_s21 = smov 0   ;;  %s1549_s22 = smov 0   ;;  %s1941_s0 = inlined_call_operand.vmem [shape: bf16[256,256], index: 0, kind: input, shape index: {}]   ;;  %s1942_s1 = inlined_call_operand.vmem [shape: f32[256,33], index: 1, kind: input, shape index: {}, may-alias: {1,2}]   ;;  %s1943_s2 = inlined_call_operand.vmem [shape: f32[256,33], index: 2, kind: input, shape index: {}, may-alias: {1,2}]   ;;  %s1944_s3 = inlined_call_operand.vmem [shape: f32[33,128], index: 3, kind: input, shape index: {}]   ;;  %s1945_s4 = inlined_call_operand.vmem [shape: f32[33,128], index: 4, kind: input, shape index: {}]   ;;  %s1946_s5 = inlined_call_operand.vmem [shape: f32[1,128], index: 5, kind: input, shape index: {}]   ;;  %s1947_s6 = inlined_call_operand.vmem [shape: f32[256,128], index: 6, kind: output, shape index: {}]  }
   0x1   :  { %s1551_s23 = smov 0  }
   0x2 LB: > { %s28_s24 = sadd.s32 1, %s1504_s22  ;;  %p1379_p0 = scmp.ge.s32.totalorder %s1508_s23, 1  ;;  %s1508_s23 = sphi %s1551_s23, %s16_s23   ;;  %s1504_s22 = sphi %s1549_s22, %s1949_s22   ;;  %s1500_s21 = sphi %s1547_s21, %s1948_s21  }
   0x3   : > { %p30_p1 = scmp.ge.s32.totalorder %s28_s24, 2  ;;  %p255_p2 = scmp.lt.s32.totalorder %s1508_s23, 3 }
   0x5   : > { %s1951_s24 = smov (%p30_p1, %s28_s24), 0  ;;  %p256_p3 = pnand %p1379_p0, %p255_p2 }
   0x6   : > { %s1380_s29 = sshll.u32 (!%p256_p3), %s1500_s21, 4 }
   0x7   : > { %259 = sbr.rel (%p256_p3) target bundleno = 576 (0x240), region = 44  ;;  %p302_p4 = scmp.lt.s32.totalorder (!%p256_p3), %s1380_s29, 31 }
   0xc   : > { %v430_v0 = vld [vmem:[%s1942_s1 + $0x78] sm:$0xff]  ;;  %v429_v2 = vld [vmem:[%s1942_s1 + $0x70] sm:$0xff]  ;;  %v428_v4 = vld [vmem:[%s1942_s1 + $0x68] sm:$0xff]  ;;  %s1953_s29 = smov (!%p302_p4, %s1380_s29), 31  ;;  %vm334_vm0 = vcmask 269312  }
   0xd   : > { %v446_v1 = vld [vmem:[%s1942_s1 + $0xf8] sm:$0xff]  ;;  %447 = vmatpush.msra.mxu0 %v430_v0  ;;  %v445_v3 = vld [vmem:[%s1942_s1 + $0xf0] sm:$0xff]  ;;  %v444_v5 = vld [vmem:[%s1942_s1 + $0xe8] sm:$0xff]  ;;  %s1634_s30 = sshll.u32 %s1953_s29, 3 }
   0xe   : > { %512 = vmatpush.msra.mxu1 %v446_v1  ;;  %v427_v6 = vld [vmem:[%s1942_s1 + $0x60] sm:$0xff]  ;;  %v426_v8 = vld [vmem:[%s1942_s1 + $0x58] sm:$0xff]  ;;  %v425_v10 = vld [vmem:[%s1942_s1 + $0x50] sm:$0xff]  ;;  %s1652_s15 = scalar_lea.vmem %s1941_s0, %s1634_s30  ;;  %s1801_s8 = scalar_lea.vmem %s1943_s2, %s1634_s30 }
   0xf   : > { %448 = vmatpush.msra.mxu0 %v429_v2  ;;  %v443_v7 = vld [vmem:[%s1942_s1 + $0xe0] sm:$0xff]  ;;  %v442_v9 = vld [vmem:[%s1942_s1 + $0xd8] sm:$0xff]  ;;  %v441_v11 = vld [vmem:[%s1942_s1 + $0xd0] sm:$0xff] }
  0x10   : > { %513 = vmatpush.msra.mxu1 %v445_v3  ;;  %v424_v12 = vld [vmem:[%s1942_s1 + $0x48] sm:$0xff]  ;;  %v423_v14 = vld [vmem:[%s1942_s1 + $0x40] sm:$0xff]  ;;  %v422_v16 = vld [vmem:[%s1942_s1 + $0x38] sm:$0xff] }
  0x11   : > { %449 = vmatpush.msra.mxu0 %v428_v4  ;;  %v440_v13 = vld [vmem:[%s1942_s1 + $0xc8] sm:$0xff]  ;;  %v439_v15 = vld [vmem:[%s1942_s1 + $0xc0] sm:$0xff]  ;;  %v438_v17 = vld [vmem:[%s1942_s1 + $0xb8] sm:$0xff]  ;;  %v1510_v4 = vmov 0.0  }
  0x12   : > { %514 = vmatpush.msra.mxu1 %v444_v5  ;;  %v421_v18 = vld [vmem:[%s1942_s1 + $0x30] sm:$0xff]  ;;  %v420_v20 = vld [vmem:[%s1942_s1 + $0x28] sm:$0xff]  ;;  %v419_v22 = vld [vmem:[%s1942_s1 + $0x20] sm:$0xff]  ;;  %335 = vst.msk [vmem:[#allocation2] sm:$0xff] %vm334_vm0, %v1510_v4 }
  0x13   : > { %450 = vmatpush.msra.mxu0 %v427_v6  ;;  %v437_v19 = vld [vmem:[%s1942_s1 + $0xb0] sm:$0xff]  ;;  %v436_v21 = vld [vmem:[%s1942_s1 + $0xa8] sm:$0xff]  ;;  %v435_v23 = vld [vmem:[%s1942_s1 + $0xa0] sm:$0xff]  ;;  %336 = vst.msk [vmem:[#allocation2 + $0x8] sm:$0xff] %vm334_vm0, %v1510_v4 }
  0x14   : > { %515 = vmatpush.msra.mxu1 %v443_v7  ;;  %v418_v24 = vld [vmem:[%s1942_s1 + $0x18] sm:$0xff]  ;;  %v417_v26 = vld [vmem:[%s1942_s1 + $0x10] sm:$0xff]  ;;  %v351_v28 = vld [vmem:[%s1652_s15] sm:$0xff]  ;;  %337 = vst.msk [vmem:[#allocation2 + $0x10] sm:$0xff] %vm334_vm0, %v1510_v4 }
  0x15   : > { %451 = vmatpush.msra.mxu0 %v426_v8  ;;  %v434_v25 = vld [vmem:[%s1942_s1 + $0x98] sm:$0xff]  ;;  %v433_v27 = vld [vmem:[%s1942_s1 + $0x90] sm:$0xff]  ;;  %v416_v29 = vld [vmem:[%s1942_s1 + $0x8] sm:$0xff]  ;;  %v367_v33 = vunpack.c.l.bf16 %v351_v28  ;;  %v368_v34 = vunpack.c.h.bf16 %v351_v28  ;;  %338 = vst.msk [vmem:[#allocation2 + $0x18] sm:$0xff] %vm334_vm0, %v1510_v4 }
  0x16   : > { %516 = vmatpush.msra.mxu1 %v442_v9  ;;  %v432_v30 = vld [vmem:[%s1942_s1 + $0x88] sm:$0xff]  ;;  %v415_v31 = vld [vmem:[%s1942_s1] sm:$0xff]  ;;  %v353_v38 = vld [vmem:[%s1652_s15 + $0x10] sm:$0xff]  ;;  %339 = vst.msk [vmem:[#allocation2 + $0x20] sm:$0xff] %vm334_vm0, %v1510_v4 }
  0x17   : > { %452 = vmatpush.msra.mxu0 %v425_v10  ;;  %v431_v32 = vld [vmem:[%s1942_s1 + $0x80] sm:$0xff]  ;;  %v352_v35 = vld [vmem:[%s1652_s15 + $0x8] sm:$0xff]  ;;  %v371_v39 = vunpack.c.l.bf16 %v353_v38  ;;  %v372_v40 = vunpack.c.h.bf16 %v353_v38  ;;  %v354_v41 = vld [vmem:[%s1652_s15 + $0x18] sm:$0xff]  ;;  %340 = vst.msk [vmem:[#allocation2 + $0x28] sm:$0xff] %vm334_vm0, %v1510_v4 }
  0x18   : > { %517 = vmatpush.msra.mxu1 %v441_v11  ;;  %v369_v36 = vunpack.c.l.bf16 %v352_v35  ;;  %v370_v37 = vunpack.c.h.bf16 %v352_v35  ;;  %v373_v42 = vunpack.c.l.bf16 %v354_v41  ;;  %v374_v43 = vunpack.c.h.bf16 %v354_v41  ;;  %v355_v44 = vld [vmem:[%s1652_s15 + $0x20] sm:$0xff]  ;;  %v356_v47 = vld [vmem:[%s1652_s15 + $0x28] sm:$0xff]  ;;  %v357_v50 = vld [vmem:[%s1652_s15 + $0x30] sm:$0xff]  ;;  %341 = vst.msk [vmem:[#allocation2 + $0x30] sm:$0xff] %vm334_vm0, %v1510_v4 }
  0x19   : > { %453 = vmatpush.msra.mxu0 %v424_v12  ;;  %v375_v45 = vunpack.c.l.bf16 %v355_v44  ;;  %v376_v46 = vunpack.c.h.bf16 %v355_v44  ;;  %v377_v48 = vunpack.c.l.bf16 %v356_v47  ;;  %v378_v49 = vunpack.c.h.bf16 %v356_v47  ;;  %v358_v53 = vld [vmem:[%s1652_s15 + $0x38] sm:$0xff]  ;;  %v359_v56 = vld [vmem:[%s1652_s15 + $0x40] sm:$0xff]  ;;  %v360_v59 = vld [vmem:[%s1652_s15 + $0x48] sm:$0xff]  ;;  %342 = vst.msk [vmem:[#allocation2 + $0x38] sm:$0xff] %vm334_vm0, %v1510_v4 }
  0x1a   : > { %518 = vmatpush.msra.mxu1 %v440_v13  ;;  %v379_v51 = vunpack.c.l.bf16 %v357_v50  ;;  %v380_v52 = vunpack.c.h.bf16 %v357_v50  ;;  %v381_v54 = vunpack.c.l.bf16 %v358_v53  ;;  %v382_v55 = vunpack.c.h.bf16 %v358_v53  ;;  %v361_v62 = vld [vmem:[%s1652_s15 + $0x50] sm:$0xff]  ;;  %v362_v1 = vld [vmem:[%s1652_s15 + $0x58] sm:$0xff]  ;;  %v363_v5 = vld [vmem:[%s1652_s15 + $0x60] sm:$0xff]  ;;  %343 = vst.msk [vmem:[#allocation2 + $0x40] sm:$0xff] %vm334_vm0, %v1510_v4 }
  0x1b   : > { %454 = vmatpush.msra.mxu0 %v423_v14  ;;  %v383_v57 = vunpack.c.l.bf16 %v359_v56  ;;  %v384_v58 = vunpack.c.h.bf16 %v359_v56  ;;  %v385_v60 = vunpack.c.l.bf16 %v360_v59  ;;  %v386_v61 = vunpack.c.h.bf16 %v360_v59  ;;  %v364_v8 = vld [vmem:[%s1652_s15 + $0x68] sm:$0xff]  ;;  %344 = vst.msk [vmem:[#allocation2 + $0x48] sm:$0xff] %vm334_vm0, %v1510_v4  ;;  %v365_v11 = vld [vmem:[%s1652_s15 + $0x70] sm:$0xff]  ;;  %v366_v14 = vld [vmem:[%s1652_s15 + $0x78] sm:$0xff]  ;;  %s1898_s15 = scalar_lea.vmem %s1947_s6, %s1634_s30 }
  0x1c   : > { %519 = vmatpush.msra.mxu1 %v439_v15  ;;  %v387_v63 = vunpack.c.l.bf16 %v361_v62  ;;  %v388_v0 = vunpack.c.h.bf16 %v361_v62  ;;  %v389_v2 = vunpack.c.l.bf16 %v362_v1  ;;  %v390_v3 = vunpack.c.h.bf16 %v362_v1  ;;  %345 = vst.msk [vmem:[#allocation2 + $0x50] sm:$0xff] %vm334_vm0, %v1510_v4 }
  0x1d   : > { %455 = vmatpush.msra.mxu0 %v422_v16  ;;  %v391_v6 = vunpack.c.l.bf16 %v363_v5  ;;  %v392_v7 = vunpack.c.h.bf16 %v363_v5  ;;  %346 = vst.msk [vmem:[#allocation2 + $0x58] sm:$0xff] %vm334_vm0, %v1510_v4  ;;  %v393_v9 = vunpack.c.l.bf16 %v364_v8  ;;  %v394_v10 = vunpack.c.h.bf16 %v364_v8 }
  0x1e   : > { %520 = vmatpush.msra.mxu1 %v438_v17  ;;  %347 = vst.msk [vmem:[#allocation2 + $0x60] sm:$0xff] %vm334_vm0, %v1510_v4  ;;  %v395_v12 = vunpack.c.l.bf16 %v365_v11  ;;  %v396_v13 = vunpack.c.h.bf16 %v365_v11  ;;  %v397_v15 = vunpack.c.l.bf16 %v366_v14  ;;  %v398_v16 = vunpack.c.h.bf16 %v366_v14 }
  0x1f   : > { %456 = vmatpush.msra.mxu0 %v421_v18  ;;  %348 = vst.msk [vmem:[#allocation2 + $0x68] sm:$0xff] %vm334_vm0, %v1510_v4  ;;  %v1511_v17 = vmov 32  }
  0x20   : > { %521 = vmatpush.msra.mxu1 %v437_v19  ;;  %349 = vst.msk [vmem:[#allocation2 + $0x70] sm:$0xff] %vm334_vm0, %v1510_v4  ;;  %1450 = vset.pattern.permute.xlu0 %v1511_v17  ;;  %v399_v19 = vld [vmem:[#allocation2] sm:$0xff] }
  0x21   : > { %457 = vmatpush.msra.mxu0 %v420_v20  ;;  %350 = vst.msk [vmem:[#allocation2 + $0x78] sm:$0xff] %vm334_vm0, %v1510_v4  ;;  %1451 = vset.pattern.permute.xlu1 %v1511_v17 }
  0x22   : > { %522 = vmatpush.msra.mxu1 %v436_v21  ;;  %1452 = vset.pattern.permute.xlu2 %v1511_v17 }
  0x23   : > { %458 = vmatpush.msra.mxu0 %v419_v22 }
  0x24   : > { %523 = vmatpush.msra.mxu1 %v435_v23 }
  0x25   : > { %459 = vmatpush.msra.mxu0 %v418_v24  ;;  %v400_v24 = vld [vmem:[#allocation2 + $0x8] sm:$0xff] }
  0x26   : > { %524 = vmatpush.msra.mxu1 %v434_v25 }
  0x27   : > { %460 = vmatpush.msra.mxu0 %v417_v26 }
  0x28   : > { %525 = vmatpush.msra.mxu1 %v433_v27 }
  0x29   : > { %461 = vmatpush.msra.mxu0 %v416_v29 }
  0x2a   : > { %526 = vmatpush.msra.mxu1 %v432_v30 }
  0x2b   : > { %462 = vmatpush.msra.mxu0 %v415_v31  ;;  %v401_v31 = vld [vmem:[#allocation2 + $0x10] sm:$0xff] }
  0x2c   : > { %527 = vmatpush.msra.mxu1 %v431_v32  ;;  %463 = vmatmul.f32.vlgmr.msra.gmra.mxu0 %v367_v33 }
  0x2d   : > { %528 = vmatmul.f32.vlgmr.msra.gmra.mxu1 %v368_v34 }
  0x34   : > { %466 = vmatmul.f32.gmra.mxu0 %v369_v36 }
  0x35   : > { %531 = vmatmul.f32.gmra.mxu1 %v370_v37 }
  0x3c   : > { %469 = vmatmul.f32.gmra.mxu0 %v371_v39 }
  0x3d   : > { %534 = vmatmul.f32.gmra.mxu1 %v372_v40  ;;  %v402_v40 = vld [vmem:[#allocation2 + $0x18] sm:$0xff] }
  0x44   : > { %472 = vmatmul.f32.gmra.mxu0 %v373_v42 }
  0x45   : > { %537 = vmatmul.f32.gmra.mxu1 %v374_v43 }
  0x4c   : > { %475 = vmatmul.f32.gmra.mxu0 %v375_v45 }
  0x4d   : > { %540 = vmatmul.f32.gmra.mxu1 %v376_v46 }
  0x54   : > { %478 = vmatmul.f32.gmra.mxu0 %v377_v48 }
  0x55   : > { %543 = vmatmul.f32.gmra.mxu1 %v378_v49 }
  0x5c   : > { %481 = vmatmul.f32.gmra.mxu0 %v379_v51 }
  0x5d   : > { %546 = vmatmul.f32.gmra.mxu1 %v380_v52 }
  0x64   : > { %484 = vmatmul.f32.gmra.mxu0 %v381_v54 }
  0x65   : > { %549 = vmatmul.f32.gmra.mxu1 %v382_v55 }
  0x6c   : > { %487 = vmatmul.f32.gmra.mxu0 %v383_v57  ;;  %v403_v57 = vld [vmem:[#allocation2 + $0x20] sm:$0xff] }
  0x6d   : > { %552 = vmatmul.f32.gmra.mxu1 %v384_v58 }
  0x74   : > { %490 = vmatmul.f32.gmra.mxu0 %v385_v60 }
  0x75   : > { %555 = vmatmul.f32.gmra.mxu1 %v386_v61 }
  0x7c   : > { %493 = vmatmul.f32.gmra.mxu0 %v387_v63 }
  0x7d   : > { %558 = vmatmul.f32.gmra.mxu1 %v388_v0 }
  0x84   : > { %496 = vmatmul.f32.gmra.mxu0 %v389_v2 }
  0x85   : > { %561 = vmatmul.f32.gmra.mxu1 %v390_v3 }
  0x8c   : > { %499 = vmatmul.f32.gmra.mxu0 %v391_v6 }
  0x8d   : > { %564 = vmatmul.f32.gmra.mxu1 %v392_v7 }
  0x94   : > { %502 = vmatmul.f32.gmra.mxu0 %v393_v9 }
  0x95   : > { %567 = vmatmul.f32.gmra.mxu1 %v394_v10  ;;  %v404_v10 = vld [vmem:[#allocation2 + $0x28] sm:$0xff] }
  0x9c   : > { %505 = vmatmul.f32.gmra.mxu0 %v395_v12 }
  0x9d   : > { %570 = vmatmul.f32.gmra.mxu1 %v396_v13 }
  0xa4   : > { %508 = vmatmul.f32.gmra.mxu0 %v397_v15 }
  0xa5   : > { %573 = vmatmul.f32.gmra.mxu1 %v398_v16 }
  0xa9   : > { %v464_v18 = vpop.f32.mrf.mxu0 }
  0xaa   : > { %v529_v20 = vpop.f32.mrf.mxu1 }
  0xab   : > { %v530_v21 = vadd.f32 %v529_v20, %v464_v18 }
  0xad   : > { %v577_v22 = vadd.f32 %v530_v21, %v399_v19 }
  0xaf   : > { %594 = vst.msk [vmem:[#allocation2] sm:$0xff] %vm334_vm0, %v577_v22 }
  0xb1   : > { %v467_v23 = vpop.f32.mrf.mxu0 }
  0xb2   : > { %v532_v25 = vpop.f32.mrf.mxu1 }
  0xb3   : > { %v533_v26 = vadd.f32 %v532_v25, %v467_v23 }
  0xb5   : > { %v578_v27 = vadd.f32 %v533_v26, %v400_v24 }
  0xb6   : > { %v1705_v28 = vld [vmem:[#allocation2] sm:$0xff] }
  0xb7   : > { %595 = vst.msk [vmem:[#allocation2 + $0x8] sm:$0xff] %vm334_vm0, %v578_v27  ;;  %v629_v29 = vmax.f32 %v1705_v28, 1.0  ;;  %v405_v27 = vld [vmem:[#allocation2 + $0x30] sm:$0xff] }
  0xb9   : > { %1454 = vrcp.f32 %v629_v29  ;;  %v470_v30 = vpop.f32.mrf.mxu0  ;;  %v656_v44 = vand.u32 2147483648, %v629_v29  ;;  %v654_v46 = vand.u32 2147483647, %v629_v29  ;;  %vm650_vm2 = vweird.f32 %v629_v29 }
  0xba   : > { %v535_v32 = vpop.f32.mrf.mxu1 }
  0xbb   : > { %v536_v33 = vadd.f32 %v535_v32, %v470_v30  ;;  %v657_v51 = vor.u32 1.1754944e-38, %v656_v44  ;;  %vm655_vm4 = vcmp.eq.f32.partialorder %v654_v46, 8.507059e+37  ;;  %v406_v46 = vld [vmem:[#allocation2 + $0x38] sm:$0xff] }
  0xbd   : > { %v579_v34 = vadd.f32 %v536_v33, %v401_v31 }
  0xbe   : > { %v1709_v35 = vld [vmem:[#allocation2 + $0x8] sm:$0xff] }
  0xbf   : > { %v1455_v36 = vpop.eup %1454  ;;  %596 = vst.msk [vmem:[#allocation2 + $0x10] sm:$0xff] %vm334_vm0, %v579_v34  ;;  %v630_v37 = vmax.f32 %v1709_v35, 1.0 }
  0xc0   : > { %v646_v38 = vmul.f32 %v1455_v36, %v629_v29  ;;  %vm651_vm1 = vweird.f32 %v1455_v36 }
  0xc1   : > { %1456 = vrcp.f32 %v630_v37  ;;  %v473_v39 = vpop.f32.mrf.mxu0  ;;  %vm652_vm3 = vmor %vm650_vm2, %vm651_vm1  ;;  %v671_v61 = vand.u32 2147483648, %v630_v37  ;;  %v669_v63 = vand.u32 2147483647, %v630_v37  ;;  %vm665_vm6 = vweird.f32 %v630_v37 }
  0xc2   : > { %v538_v41 = vpop.f32.mrf.mxu1  ;;  %v647_v42 = vsub.f32 1.0, %v646_v38 }
  0xc3   : > { %v539_v43 = vadd.f32 %v538_v41, %v473_v39  ;;  %v672_v4 = vor.u32 1.1754944e-38, %v671_v61  ;;  %vm670_vm8 = vcmp.eq.f32.partialorder %v669_v63, 8.507059e+37 }
  0xc4   : > { %v648_v45 = vmul.f32 %v1455_v36, %v647_v42 }
  0xc5   : > { %v580_v47 = vadd.f32 %v539_v43, %v402_v40 }
  0xc6   : > { %v649_v48 = vadd.f32 %v1455_v36, %v648_v45  ;;  %v1713_v49 = vld [vmem:[#allocation2 + $0x10] sm:$0xff] }
  0xc7   : > { %v1457_v50 = vpop.eup %1456  ;;  %597 = vst.msk [vmem:[#allocation2 + $0x18] sm:$0xff] %vm334_vm0, %v580_v47  ;;  %v631_v52 = vmax.f32 %v1713_v49, 1.0 }
  0xc8   : > { %v653_v53 = vsel %vm652_vm3, %v1455_v36, %v649_v48  ;;  %v661_v54 = vmul.f32 %v1457_v50, %v630_v37  ;;  %vm666_vm5 = vweird.f32 %v1457_v50 }
  0xc9   : > { %v658_v55 = vsel %vm655_vm4, %v657_v51, %v653_v53  ;;  %1458 = vrcp.f32 %v631_v52  ;;  %v476_v58 = vpop.f32.mrf.mxu0  ;;  %vm667_vm7 = vmor %vm665_vm6, %vm666_vm5  ;;  %v686_v14 = vand.u32 2147483648, %v631_v52  ;;  %v684_v16 = vand.u32 2147483647, %v631_v52 }
  0xca   : > { %v541_v56 = vpop.f32.mrf.mxu1  ;;  %887 = vperm.xlu0 %1450, %v658_v55   ;;  %v662_v59 = vsub.f32 1.0, %v661_v54  ;;  %vm680_vm10 = vweird.f32 %v631_v52 }
  0xcb   : > { %v542_v60 = vadd.f32 %v541_v56, %v476_v58  ;;  %v687_v21 = vor.u32 1.1754944e-38, %v686_v14  ;;  %vm685_vm12 = vcmp.eq.f32.partialorder %v684_v16, 8.507059e+37 }
  0xcc   : > { %v663_v62 = vmul.f32 %v1457_v50, %v662_v59 }
  0xcd   : > { %v581_v0 = vadd.f32 %v542_v60, %v403_v57 }
  0xce   : > { %v664_v1 = vadd.f32 %v1457_v50, %v663_v62  ;;  %v1717_v2 = vld [vmem:[#allocation2 + $0x18] sm:$0xff] }
  0xcf   : > { %v1459_v3 = vpop.eup %1458  ;;  %598 = vst.msk [vmem:[#allocation2 + $0x20] sm:$0xff] %vm334_vm0, %v581_v0  ;;  %v632_v5 = vmax.f32 %v1717_v2, 1.0  ;;  %v407_v0 = vld [vmem:[#allocation2 + $0x40] sm:$0xff] }
  0xd0   : > { %v668_v6 = vsel %vm667_vm7, %v1457_v50, %v664_v1  ;;  %v676_v7 = vmul.f32 %v1459_v3, %v631_v52  ;;  %vm681_vm9 = vweird.f32 %v1459_v3 }
  0xd1   : > { %v673_v8 = vsel %vm670_vm8, %v672_v4, %v668_v6  ;;  %1460 = vrcp.f32 %v632_v5  ;;  %v479_v11 = vpop.f32.mrf.mxu0  ;;  %vm682_vm11 = vmor %vm680_vm10, %vm681_vm9  ;;  %v701_v32 = vand.u32 2147483648, %v632_v5  ;;  %v699_v34 = vand.u32 2147483647, %v632_v5 }
  0xd2   : > { %v544_v9 = vpop.f32.mrf.mxu1  ;;  %892 = vperm.xlu0 %1450, %v673_v8   ;;  %v677_v12 = vsub.f32 1.0, %v676_v7  ;;  %vm695_vm14 = vweird.f32 %v632_v5 }
  0xd3   : > { %v545_v13 = vadd.f32 %v544_v9, %v479_v11  ;;  %v702_v40 = vor.u32 1.1754944e-38, %v701_v32  ;;  %vm700_vm1 = vcmp.eq.f32.partialorder %v699_v34, 8.507059e+37 }
  0xd4   : > { %v678_v15 = vmul.f32 %v1459_v3, %v677_v12 }
  0xd5   : > { %v582_v17 = vadd.f32 %v545_v13, %v404_v10 }
  0xd6   : > { %v679_v18 = vadd.f32 %v1459_v3, %v678_v15  ;;  %v1721_v19 = vld [vmem:[#allocation2 + $0x20] sm:$0xff] }
  0xd7   : > { %v1461_v20 = vpop.eup %1460  ;;  %599 = vst.msk [vmem:[#allocation2 + $0x28] sm:$0xff] %vm334_vm0, %v582_v17  ;;  %v633_v22 = vmax.f32 %v1721_v19, 1.0 }
  0xd8   : > { %v683_v23 = vsel %vm682_vm11, %v1459_v3, %v679_v18  ;;  %v691_v24 = vmul.f32 %v1461_v20, %v632_v5  ;;  %vm696_vm13 = vweird.f32 %v1461_v20  ;;  %v408_v18 = vld [vmem:[#allocation2 + $0x48] sm:$0xff] }
  0xd9   : > { %v688_v25 = vsel %vm685_vm12, %v687_v21, %v683_v23  ;;  %1462 = vrcp.f32 %v633_v22  ;;  %v482_v29 = vpop.f32.mrf.mxu0  ;;  %vm697_vm15 = vmor %vm695_vm14, %vm696_vm13  ;;  %v716_v51 = vand.u32 2147483648, %v633_v22  ;;  %v714_v53 = vand.u32 2147483647, %v633_v22 }
  0xda   : > { %v547_v26 = vpop.f32.mrf.mxu1  ;;  %897 = vperm.xlu1 %1451, %v688_v25   ;;  %v692_v30 = vsub.f32 1.0, %v691_v24  ;;  %vm710_vm3 = vweird.f32 %v633_v22 }
  0xdb   : > { %v548_v31 = vadd.f32 %v547_v26, %v482_v29  ;;  %v717_v58 = vor.u32 1.1754944e-38, %v716_v51  ;;  %vm715_vm5 = vcmp.eq.f32.partialorder %v714_v53, 8.507059e+37 }
  0xdc   : > { %v693_v33 = vmul.f32 %v1461_v20, %v692_v30 }
  0xdd   : > { %v583_v36 = vadd.f32 %v548_v31, %v405_v27 }
  0xde   : > { %v694_v37 = vadd.f32 %v1461_v20, %v693_v33  ;;  %v1725_v38 = vld [vmem:[#allocation2 + $0x28] sm:$0xff] }
  0xdf   : > { %v1463_v39 = vpop.eup %1462  ;;  %600 = vst.msk [vmem:[#allocation2 + $0x30] sm:$0xff] %vm334_vm0, %v583_v36  ;;  %v634_v41 = vmax.f32 %v1725_v38, 1.0 }
  0xe0   : > { %v698_v42 = vsel %vm697_vm15, %v1461_v20, %v694_v37  ;;  %v706_v43 = vmul.f32 %v1463_v39, %v633_v22  ;;  %vm711_vm2 = vweird.f32 %v1463_v39 }
  0xe1   : > { %v703_v44 = vsel %vm700_vm1, %v702_v40, %v698_v42  ;;  %1464 = vrcp.f32 %v634_v41  ;;  %v485_v47 = vpop.f32.mrf.mxu0  ;;  %vm712_vm4 = vmor %vm710_vm3, %vm711_vm2  ;;  %v731_v5 = vand.u32 2147483648, %v634_v41  ;;  %v729_v7 = vand.u32 2147483647, %v634_v41 }
  0xe2   : > { %v550_v45 = vpop.f32.mrf.mxu1  ;;  %902 = vperm.xlu1 %1451, %v703_v44   ;;  %v707_v48 = vsub.f32 1.0, %v706_v43  ;;  %vm725_vm7 = vweird.f32 %v634_v41 }
  0xe3   : > { %v551_v50 = vadd.f32 %v550_v45, %v485_v47  ;;  %v732_v12 = vor.u32 1.1754944e-38, %v731_v5  ;;  %vm730_vm9 = vcmp.eq.f32.partialorder %v729_v7, 8.507059e+37 }
  0xe4   : > { %v708_v52 = vmul.f32 %v1463_v39, %v707_v48 }
  0xe5   : > { %v584_v54 = vadd.f32 %v551_v50, %v406_v46 }
  0xe6   : > { %v709_v55 = vadd.f32 %v1463_v39, %v708_v52  ;;  %v1729_v56 = vld [vmem:[#allocation2 + $0x30] sm:$0xff] }
  0xe7   : > { %v1465_v57 = vpop.eup %1464  ;;  %601 = vst.msk [vmem:[#allocation2 + $0x38] sm:$0xff] %vm334_vm0, %v584_v54  ;;  %v635_v59 = vmax.f32 %v1729_v56, 1.0 }
  0xe8   : > { %v713_v60 = vsel %vm712_vm4, %v1463_v39, %v709_v55  ;;  %v721_v61 = vmul.f32 %v1465_v57, %v634_v41  ;;  %vm726_vm6 = vweird.f32 %v1465_v57  ;;  %v409_v39 = vld [vmem:[#allocation2 + $0x50] sm:$0xff] }
  0xe9   : > { %v718_v62 = vsel %vm715_vm5, %v717_v58, %v713_v60  ;;  %1466 = vrcp.f32 %v635_v59  ;;  %v488_v1 = vpop.f32.mrf.mxu0  ;;  %vm727_vm8 = vmor %vm725_vm7, %vm726_vm6  ;;  %v746_v23 = vand.u32 2147483648, %v635_v59  ;;  %v744_v25 = vand.u32 2147483647, %v635_v59  ;;  %v410_v58 = vld [vmem:[#allocation2 + $0x58] sm:$0xff] }
  0xea   : > { %v553_v63 = vpop.f32.mrf.mxu1  ;;  %907 = vperm.xlu2 %1452, %v718_v62   ;;  %v722_v3 = vsub.f32 1.0, %v721_v61  ;;  %vm740_vm11 = vweird.f32 %v635_v59 }
  0xeb   : > { %v554_v4 = vadd.f32 %v553_v63, %v488_v1  ;;  %v747_v31 = vor.u32 1.1754944e-38, %v746_v23  ;;  %vm745_vm13 = vcmp.eq.f32.partialorder %v744_v25, 8.507059e+37 }
  0xec   : > { %v723_v6 = vmul.f32 %v1465_v57, %v722_v3 }
  0xed   : > { %v585_v8 = vadd.f32 %v554_v4, %v407_v0 }
  0xee   : > { %v724_v9 = vadd.f32 %v1465_v57, %v723_v6  ;;  %v1733_v10 = vld [vmem:[#allocation2 + $0x38] sm:$0xff] }
  0xef   : > { %v1467_v11 = vpop.eup %1466  ;;  %602 = vst.msk [vmem:[#allocation2 + $0x40] sm:$0xff] %vm334_vm0, %v585_v8  ;;  %v636_v13 = vmax.f32 %v1733_v10, 1.0 }
  0xf0   : > { %v728_v14 = vsel %vm727_vm8, %v1465_v57, %v724_v9  ;;  %v736_v15 = vmul.f32 %v1467_v11, %v635_v59  ;;  %vm741_vm10 = vweird.f32 %v1467_v11 }
  0xf1   : > { %v733_v16 = vsel %vm730_vm9, %v732_v12, %v728_v14  ;;  %1468 = vrcp.f32 %v636_v13  ;;  %v491_v20 = vpop.f32.mrf.mxu0  ;;  %vm742_vm12 = vmor %vm740_vm11, %vm741_vm10  ;;  %v761_v43 = vand.u32 2147483648, %v636_v13  ;;  %v759_v45 = vand.u32 2147483647, %v636_v13 }
  0xf2   : > { %v556_v17 = vpop.f32.mrf.mxu1  ;;  %912 = vperm.xlu2 %1452, %v733_v16   ;;  %v737_v21 = vsub.f32 1.0, %v736_v15  ;;  %vm755_vm15 = vweird.f32 %v636_v13  ;;  %vm1055_vm11 = vcmask 1040384  }
  0xf3   : > { %v557_v22 = vadd.f32 %v556_v17, %v491_v20  ;;  %v762_v51 = vor.u32 1.1754944e-38, %v761_v43  ;;  %vm760_vm2 = vcmp.eq.f32.partialorder %v759_v45, 8.507059e+37  ;;  %v1000_v43 = vld [vmem:[%s1944_s3 + $0x18] sm:$0xff] }
  0xf4   : > { %v738_v24 = vmul.f32 %v1467_v11, %v737_v21 }
  0xf5   : > { %v586_v26 = vadd.f32 %v557_v22, %v408_v18 }
  0xf6   : > { %v739_v27 = vadd.f32 %v1467_v11, %v738_v24  ;;  %v1737_v29 = vld [vmem:[#allocation2 + $0x40] sm:$0xff] }
  0xf7   : > { %v1469_v30 = vpop.eup %1468  ;;  %603 = vst.msk [vmem:[#allocation2 + $0x48] sm:$0xff] %vm334_vm0, %v586_v26  ;;  %v637_v32 = vmax.f32 %v1737_v29, 1.0 }
  0xf8   : > { %v743_v33 = vsel %vm742_vm12, %v1467_v11, %v739_v27  ;;  %v751_v34 = vmul.f32 %v1469_v30, %v636_v13  ;;  %vm756_vm14 = vweird.f32 %v1469_v30  ;;  %v411_v13 = vld [vmem:[#allocation2 + $0x60] sm:$0xff] }
  0xf9   : > { %v748_v36 = vsel %vm745_vm13, %v747_v31, %v743_v33  ;;  %1470 = vrcp.f32 %v637_v32  ;;  %v494_v40 = vpop.f32.mrf.mxu0  ;;  %vm757_vm1 = vmor %vm755_vm15, %vm756_vm14  ;;  %v776_v62 = vand.u32 2147483648, %v637_v32  ;;  %v774_v0 = vand.u32 2147483647, %v637_v32  ;;  %v412_v33 = vld [vmem:[#allocation2 + $0x68] sm:$0xff] }
  0xfa   : > { %v559_v37 = vpop.f32.mrf.mxu1  ;;  %917 = vperm.xlu0 %1450, %v748_v36   ;;  %v752_v41 = vsub.f32 1.0, %v751_v34  ;;  %vm770_vm4 = vweird.f32 %v637_v32 }
  0xfb   : > { %v560_v42 = vadd.f32 %v559_v37, %v494_v40  ;;  %v777_v6 = vor.u32 1.1754944e-38, %v776_v62  ;;  %vm775_vm6 = vcmp.eq.f32.partialorder %v774_v0, 8.507059e+37  ;;  %v1006_v37 = vld [vmem:[%s1945_s4 + $0x20] sm:$0x1]  ;;  %v1003_v0 = vld [vmem:[%s1945_s4 + $0x8] sm:$0xff] }
  0xfc   : > { %v753_v44 = vmul.f32 %v1469_v30, %v752_v41  ;;  %1387 = vmatpush.msk.msra.mxu2 %vm1055_vm11, %v1006_v37 }
  0xfd   : > { %v587_v46 = vadd.f32 %v560_v42, %v409_v39  ;;  %v1005_v39 = vld [vmem:[%s1945_s4 + $0x18] sm:$0xff]  ;;  %v1001_v42 = vld [vmem:[%s1944_s3 + $0x20] sm:$0x1] }
  0xfe   : > { %v754_v47 = vadd.f32 %v1469_v30, %v753_v44  ;;  %v1741_v48 = vld [vmem:[#allocation2 + $0x48] sm:$0xff]  ;;  %1404 = vmatpush.msk.msra.mxu3 %vm1055_vm11, %v1001_v42  ;;  %1071 = vmatpush.msra.mxu2 %v1005_v39 }
  0xff   : > { %v1471_v50 = vpop.eup %1470  ;;  %604 = vst.msk [vmem:[#allocation2 + $0x50] sm:$0xff] %vm334_vm0, %v587_v46  ;;  %v638_v52 = vmax.f32 %v1741_v48, 1.0  ;;  %v1004_v46 = vld [vmem:[%s1945_s4 + $0x10] sm:$0xff] }
 0x100   : > { %v758_v53 = vsel %vm757_vm1, %v1469_v30, %v754_v47  ;;  %v766_v54 = vmul.f32 %v1471_v50, %v637_v32  ;;  %vm771_vm3 = vweird.f32 %v1471_v50  ;;  %1187 = vmatpush.msra.mxu3 %v1000_v43  ;;  %1072 = vmatpush.msra.mxu2 %v1004_v46 }
 0x101   : > { %v763_v55 = vsel %vm760_vm2, %v762_v51, %v758_v53  ;;  %1472 = vrcp.f32 %v638_v52  ;;  %v497_v59 = vpop.f32.mrf.mxu0  ;;  %vm772_vm5 = vmor %vm770_vm4, %vm771_vm3  ;;  %v791_v17 = vand.u32 2147483648, %v638_v52  ;;  %v789_v20 = vand.u32 2147483647, %v638_v52 }
 0x102   : > { %v562_v57 = vpop.f32.mrf.mxu1  ;;  %922 = vperm.xlu1 %1451, %v763_v55   ;;  %v767_v60 = vsub.f32 1.0, %v766_v54  ;;  %vm785_vm8 = vweird.f32 %v638_v52  ;;  %1073 = vmatpush.msra.mxu2 %v1003_v0 }
 0x103   : > { %v563_v61 = vadd.f32 %v562_v57, %v497_v59  ;;  %v792_v25 = vor.u32 1.1754944e-38, %v791_v17  ;;  %vm790_vm10 = vcmp.eq.f32.partialorder %v789_v20, 8.507059e+37  ;;  %v981_v17 = vld [vmem:[%s1801_s8] sm:$0xff] }
 0x104   : > { %v768_v63 = vmul.f32 %v1471_v50, %v767_v60 }
 0x105   : > { %v588_v1 = vadd.f32 %v563_v61, %v410_v58  ;;  %v413_v61 = vld [vmem:[#allocation2 + $0x70] sm:$0xff] }
 0x106   : > { %v769_v3 = vadd.f32 %v1471_v50, %v768_v63  ;;  %v1745_v4 = vld [vmem:[#allocation2 + $0x50] sm:$0xff] }
 0x107   : > { %v1473_v5 = vpop.eup %1472  ;;  %605 = vst.msk [vmem:[#allocation2 + $0x58] sm:$0xff] %vm334_vm0, %v588_v1  ;;  %v1749_v7 = vmax.f32 %v1745_v4, 1.0  ;;  %v998_v1 = vld [vmem:[%s1944_s3 + $0x8] sm:$0xff] }
 0x108   : > { %v773_v8 = vsel %vm772_vm5, %v1471_v50, %v769_v3  ;;  %v781_v9 = vmul.f32 %v1473_v5, %v638_v52  ;;  %vm786_vm7 = vweird.f32 %v1473_v5  ;;  %v999_v50 = vld [vmem:[%s1944_s3 + $0x10] sm:$0xff] }
 0x109   : > { %v778_v11 = vsel %vm775_vm6, %v777_v6, %v773_v8  ;;  %1474 = vrcp.f32 %v1749_v7  ;;  %v500_v14 = vpop.f32.mrf.mxu0  ;;  %vm787_vm9 = vmor %vm785_vm8, %vm786_vm7  ;;  %v806_v41 = vand.u32 2147483648, %v1749_v7  ;;  %v804_v45 = vand.u32 2147483647, %v1749_v7  ;;  %1188 = vmatpush.msra.mxu3 %v999_v50 }
 0x10a   : > { %v565_v12 = vpop.f32.mrf.mxu1  ;;  %927 = vperm.xlu2 %1452, %v778_v11   ;;  %v782_v15 = vsub.f32 1.0, %v781_v9  ;;  %vm800_vm13 = vweird.f32 %v1749_v7  ;;  %v1002_v9 = vld [vmem:[%s1945_s4] sm:$0xff] }
 0x10b   : > { %v566_v16 = vadd.f32 %v565_v12, %v500_v14  ;;  %v807_v54 = vor.u32 1.1754944e-38, %v806_v41  ;;  %vm805_vm15 = vcmp.eq.f32.partialorder %v804_v45, 8.507059e+37  ;;  %1189 = vmatpush.msra.mxu3 %v998_v1  ;;  %v997_v11 = vld [vmem:[%s1944_s3] sm:$0xff]  ;;  %1074 = vmatpush.msra.mxu2 %v1002_v9  ;;  %v982_v41 = vld [vmem:[%s1801_s8 + $0x8] sm:$0xff] }
 0x10c   : > { %v783_v18 = vmul.f32 %v1473_v5, %v782_v15 }
 0x10d   : > { %v589_v21 = vadd.f32 %v566_v16, %v411_v13  ;;  %1190 = vmatpush.msra.mxu3 %v997_v11 }
 0x10e   : > { %v784_v22 = vadd.f32 %v1473_v5, %v783_v18  ;;  %v1752_v23 = vld [vmem:[#allocation2 + $0x58] sm:$0xff]  ;;  %1405 = vmatmul.msk.f32.vlgmr.msra.gmra.mxu3 %vm334_vm0, %v981_v17 }
 0x10f   : > { %v1475_v24 = vpop.eup %1474  ;;  %606 = vst.msk [vmem:[#allocation2 + $0x60] sm:$0xff] %vm334_vm0, %v589_v21  ;;  %v1756_v26 = vmax.f32 %v1752_v23, 1.0 }
 0x110   : > { %v788_v27 = vsel %vm787_vm9, %v1473_v5, %v784_v22  ;;  %v796_v30 = vmul.f32 %v1475_v24, %v1749_v7  ;;  %vm801_vm12 = vweird.f32 %v1475_v24 }
 0x111   : > { %v793_v31 = vsel %vm790_vm10, %v792_v25, %v788_v27  ;;  %1476 = vrcp.f32 %v1756_v26  ;;  %v503_v34 = vpop.f32.mrf.mxu0  ;;  %vm802_vm14 = vmor %vm800_vm13, %vm801_vm12  ;;  %v821_v5 = vand.u32 2147483648, %v1756_v26  ;;  %v819_v7 = vand.u32 2147483647, %v1756_v26 }
 0x112   : > { %v568_v32 = vpop.f32.mrf.mxu1  ;;  %932 = vperm.xlu0 %1450, %v793_v31   ;;  %v797_v36 = vsub.f32 1.0, %v796_v30  ;;  %vm815_vm2 = vweird.f32 %v1756_v26 }
 0x113   : > { %v569_v40 = vadd.f32 %v568_v32, %v503_v34  ;;  %v822_v15 = vor.u32 1.1754944e-38, %v821_v5  ;;  %vm820_vm4 = vcmp.eq.f32.partialorder %v819_v7, 8.507059e+37  ;;  %v984_v7 = vld [vmem:[%s1801_s8 + $0x18] sm:$0xff] }
 0x114   : > { %v798_v44 = vmul.f32 %v1475_v24, %v797_v36 }
 0x115   : > { %v590_v47 = vadd.f32 %v569_v40, %v412_v33 }
 0x116   : > { %v799_v51 = vadd.f32 %v1475_v24, %v798_v44  ;;  %v1781_v52 = vld [vmem:[#allocation2 + $0x60] sm:$0xff]  ;;  %1406 = vmatmul.msk.f32.gmra.mxu3 %vm334_vm0, %v982_v41 }
 0x117   : > { %v1477_v53 = vpop.eup %1476  ;;  %607 = vst.msk [vmem:[#allocation2 + $0x68] sm:$0xff] %vm334_vm0, %v590_v47  ;;  %v1785_v55 = vmax.f32 %v1781_v52, 1.0 }
 0x118   : > { %v803_v57 = vsel %vm802_vm14, %v1475_v24, %v799_v51  ;;  %v811_v58 = vmul.f32 %v1477_v53, %v1756_v26  ;;  %vm816_vm1 = vweird.f32 %v1477_v53  ;;  %v414_v24 = vld [vmem:[#allocation2 + $0x78] sm:$0xff] }
 0x119   : > { %v808_v59 = vsel %vm805_vm15, %v807_v54, %v803_v57  ;;  %1478 = vrcp.f32 %v1785_v55  ;;  %v506_v62 = vpop.f32.mrf.mxu0  ;;  %vm817_vm3 = vmor %vm815_vm2, %vm816_vm1  ;;  %v836_v30 = vand.u32 2147483648, %v1785_v55  ;;  %v834_v32 = vand.u32 2147483647, %v1785_v55 }
 0x11a   : > { %v571_v60 = vpop.f32.mrf.mxu1  ;;  %937 = vperm.xlu1 %1451, %v808_v59   ;;  %v812_v63 = vsub.f32 1.0, %v811_v58  ;;  %vm830_vm6 = vweird.f32 %v1785_v55  ;;  %v983_v58 = vld [vmem:[%s1801_s8 + $0x10] sm:$0xff] }
 0x11b   : > { %v572_v3 = vadd.f32 %v571_v60, %v506_v62  ;;  %v837_v39 = vor.u32 1.1754944e-38, %v836_v30  ;;  %vm835_vm8 = vcmp.eq.f32.partialorder %v834_v32, 8.507059e+37  ;;  %v987_v32 = vld [vmem:[%s1801_s8 + $0x30] sm:$0xff] }
 0x11c   : > { %v813_v6 = vmul.f32 %v1477_v53, %v812_v63 }
 0x11d   : > { %v591_v8 = vadd.f32 %v572_v3, %v413_v61 }
 0x11e   : > { %v814_v12 = vadd.f32 %v1477_v53, %v813_v6  ;;  %v1810_v13 = vld [vmem:[#allocation2 + $0x68] sm:$0xff]  ;;  %1407 = vmatmul.msk.f32.gmra.mxu3 %vm334_vm0, %v983_v58 }
 0x11f   : > { %v1479_v14 = vpop.eup %1478  ;;  %608 = vst.msk [vmem:[#allocation2 + $0x70] sm:$0xff] %vm334_vm0, %v591_v8  ;;  %v642_v16 = vmax.f32 %v1810_v13, 1.0 }
 0x120   : > { %v818_v18 = vsel %vm817_vm3, %v1477_v53, %v814_v12  ;;  %v826_v20 = vmul.f32 %v1479_v14, %v1785_v55  ;;  %vm831_vm5 = vweird.f32 %v1479_v14 }
 0x121   : > { %v823_v21 = vsel %vm820_vm4, %v822_v15, %v818_v18  ;;  %1480 = vrcp.f32 %v642_v16  ;;  %v509_v25 = vpop.f32.mrf.mxu0  ;;  %vm832_vm7 = vmor %vm830_vm6, %vm831_vm5  ;;  %v851_v46 = vand.u32 2147483648, %v642_v16  ;;  %v849_v50 = vand.u32 2147483647, %v642_v16 }
 0x122   : > { %v574_v22 = vpop.f32.mrf.mxu1  ;;  %942 = vperm.xlu2 %1452, %v823_v21   ;;  %v827_v26 = vsub.f32 1.0, %v826_v20  ;;  %vm845_vm10 = vweird.f32 %v642_v16 }
 0x123   : > { %v575_v27 = vadd.f32 %v574_v22, %v509_v25  ;;  %v852_v55 = vor.u32 1.1754944e-38, %v851_v46  ;;  %vm850_vm12 = vcmp.eq.f32.partialorder %v849_v50, 8.507059e+37  ;;  %v985_v22 = vld [vmem:[%s1801_s8 + $0x20] sm:$0xff] }
 0x124   : > { %v828_v31 = vmul.f32 %v1479_v14, %v827_v26 }
 0x125   : > { %v592_v33 = vadd.f32 %v575_v27, %v414_v24 }
 0x126   : > { %v829_v34 = vadd.f32 %v1479_v14, %v828_v31  ;;  %v1820_v36 = vld [vmem:[#allocation2 + $0x70] sm:$0xff]  ;;  %1408 = vmatmul.msk.f32.gmra.mxu3 %vm334_vm0, %v984_v7 }
 0x127   : > { %v1481_v37 = vpop.eup %1480  ;;  %609 = vst.msk [vmem:[#allocation2 + $0x78] sm:$0xff] %vm334_vm0, %v592_v33  ;;  %v643_v40 = vmax.f32 %v1820_v36, 1.0 }
 0x128   : > { %v833_v42 = vsel %vm832_vm7, %v1479_v14, %v829_v34  ;;  %v841_v43 = vmul.f32 %v1481_v37, %v642_v16  ;;  %vm846_vm9 = vweird.f32 %v1481_v37 }
 0x129   : > { %v838_v44 = vsel %vm835_vm8, %v837_v39, %v833_v42  ;;  %1482 = vrcp.f32 %v643_v40  ;;  %vm847_vm11 = vmor %vm845_vm10, %vm846_vm9  ;;  %v866_v63 = vand.u32 2147483648, %v643_v40  ;;  %v864_v1 = vand.u32 2147483647, %v643_v40 }
 0x12a   : > { %947 = vperm.xlu0 %1450, %v838_v44   ;;  %v842_v45 = vsub.f32 1.0, %v841_v43  ;;  %vm860_vm14 = vweird.f32 %v643_v40 }
 0x12b   : > { %v867_v6 = vor.u32 1.1754944e-38, %v866_v63  ;;  %vm865_vm1 = vcmp.eq.f32.partialorder %v864_v1, 8.507059e+37 }
 0x12c   : > { %v843_v47 = vmul.f32 %v1481_v37, %v842_v45 }
 0x12e   : > { %v844_v51 = vadd.f32 %v1481_v37, %v843_v47  ;;  %v1826_v53 = vld [vmem:[#allocation2 + $0x78] sm:$0xff]  ;;  %1409 = vmatmul.msk.f32.gmra.mxu3 %vm334_vm0, %v985_v22 }
 0x12f   : > { %v1483_v54 = vpop.eup %1482  ;;  %v644_v57 = vmax.f32 %v1826_v53, 1.0 }
 0x130   : > { %v848_v59 = vsel %vm847_vm11, %v1481_v37, %v844_v51  ;;  %v856_v60 = vmul.f32 %v1483_v54, %v643_v40  ;;  %vm861_vm13 = vweird.f32 %v1483_v54 }
 0x131   : > { %v853_v61 = vsel %vm850_vm12, %v852_v55, %v848_v59  ;;  %1484 = vrcp.f32 %v644_v57  ;;  %vm862_vm15 = vmor %vm860_vm14, %vm861_vm13  ;;  %v881_v14 = vand.u32 2147483648, %v644_v57  ;;  %v879_v17 = vand.u32 2147483647, %v644_v57  ;;  %v996_v59 = vld [vmem:[%s1801_s8 + $0x78] sm:$0xff] }
 0x132   : > { %952 = vperm.xlu1 %1451, %v853_v61   ;;  %v857_v62 = vsub.f32 1.0, %v856_v60  ;;  %vm875_vm3 = vweird.f32 %v644_v57 }
 0x133   : > { %v882_v21 = vor.u32 1.1754944e-38, %v881_v14  ;;  %vm880_vm5 = vcmp.eq.f32.partialorder %v879_v17, 8.507059e+37 }
 0x134   : > { %v858_v0 = vmul.f32 %v1483_v54, %v857_v62 }
 0x136   : > { %v859_v3 = vadd.f32 %v1483_v54, %v858_v0 }
 0x137   : > { %v1485_v5 = vpop.eup %1484 }
 0x138   : > { %v863_v8 = vsel %vm862_vm15, %v1483_v54, %v859_v3  ;;  %v871_v9 = vmul.f32 %v1485_v5, %v644_v57  ;;  %vm876_vm2 = vweird.f32 %v1485_v5 }
 0x139   : > { %v868_v11 = vsel %vm865_vm1, %v867_v6, %v863_v8  ;;  %vm877_vm4 = vmor %vm875_vm3, %vm876_vm2  ;;  %v1892_v6 = vld [vmem:[%s1946_s5] ss:$0 sm:$0xff] }
 0x13a   : > { %957 = vperm.xlu2 %1452, %v868_v11   ;;  %v872_v12 = vsub.f32 1.0, %v871_v9 }
 0x13c   : > { %v888_v15 = vpop.permute.xlu0 %887  ;;  %v873_v16 = vmul.f32 %v1485_v5, %v872_v12 }
 0x13d   : > { %v965_v18 = vmul.f32 %v888_v15, %v1705_v28  ;;  %v986_v28 = vld [vmem:[%s1801_s8 + $0x28] sm:$0xff] }
 0x13e   : > { %v874_v20 = vadd.f32 %v1485_v5, %v873_v16  ;;  %1410 = vmatmul.msk.f32.gmra.mxu3 %vm334_vm0, %v986_v28 }
 0x13f   : > { %1388 = vmatmul.msk.f32.vlgmr.msra.gmra.mxu2 %vm334_vm0, %v965_v18 }
 0x140   : > { %v878_v24 = vsel %vm877_vm4, %v1485_v5, %v874_v20 }
 0x141   : > { %v883_v25 = vsel %vm880_vm5, %v882_v21, %v878_v24 }
 0x142   : > { %962 = vperm.xlu0 %1450, %v883_v25  }
 0x144   : > { %v893_v26 = vpop.permute.xlu0 %892  ;;  %v908_v37 = vpop.permute.xlu2 %907 }
 0x145   : > { %v966_v27 = vmul.f32 %v893_v26, %v1709_v35  ;;  %v988_v35 = vld [vmem:[%s1801_s8 + $0x38] sm:$0xff]  ;;  %v969_v39 = vmul.f32 %v908_v37, %v1721_v19  ;;  %v991_v19 = vld [vmem:[%s1801_s8 + $0x50] sm:$0xff] }
 0x146   : > { %1411 = vmatmul.msk.f32.gmra.mxu3 %vm334_vm0, %v987_v32 }
 0x147   : > { %1389 = vmatmul.msk.f32.gmra.mxu2 %vm334_vm0, %v966_v27 }
 0x14c   : > { %v898_v30 = vpop.permute.xlu1 %897  ;;  %v913_v40 = vpop.permute.xlu2 %912 }
 0x14d   : > { %v967_v31 = vmul.f32 %v898_v30, %v1713_v49  ;;  %v989_v49 = vld [vmem:[%s1801_s8 + $0x40] sm:$0xff]  ;;  %v970_v41 = vmul.f32 %v913_v40, %v1725_v38  ;;  %v992_v38 = vld [vmem:[%s1801_s8 + $0x58] sm:$0xff] }
 0x14e   : > { %1412 = vmatmul.msk.f32.gmra.mxu3 %vm334_vm0, %v988_v35 }
 0x14f   : > { %1390 = vmatmul.msk.f32.gmra.mxu2 %vm334_vm0, %v967_v31 }
 0x154   : > { %v903_v33 = vpop.permute.xlu1 %902 }
 0x155   : > { %v968_v34 = vmul.f32 %v903_v33, %v1717_v2  ;;  %v990_v2 = vld [vmem:[%s1801_s8 + $0x48] sm:$0xff] }
 0x156   : > { %1413 = vmatmul.msk.f32.gmra.mxu3 %vm334_vm0, %v989_v49 }
 0x157   : > { %1391 = vmatmul.msk.f32.gmra.mxu2 %vm334_vm0, %v968_v34 }
 0x15e   : > { %1414 = vmatmul.msk.f32.gmra.mxu3 %vm334_vm0, %v990_v2 }
 0x15f   : > { %1392 = vmatmul.msk.f32.gmra.mxu2 %vm334_vm0, %v969_v39 }
 0x164   : > { %v928_v46 = vpop.permute.xlu2 %927 }
 0x165   : > { %v973_v47 = vmul.f32 %v928_v46, %v1737_v29  ;;  %v995_v29 = vld [vmem:[%s1801_s8 + $0x70] sm:$0xff] }
 0x166   : > { %1415 = vmatmul.msk.f32.gmra.mxu3 %vm334_vm0, %v991_v19 }
 0x167   : > { %1393 = vmatmul.msk.f32.gmra.mxu2 %vm334_vm0, %v970_v41 }
 0x16c   : > { %v918_v42 = vpop.permute.xlu0 %917 }
 0x16d   : > { %v971_v43 = vmul.f32 %v918_v42, %v1729_v56  ;;  %v993_v56 = vld [vmem:[%s1801_s8 + $0x60] sm:$0xff] }
 0x16e   : > { %1416 = vmatmul.msk.f32.gmra.mxu3 %vm334_vm0, %v992_v38 }
 0x16f   : > { %1394 = vmatmul.msk.f32.gmra.mxu2 %vm334_vm0, %v971_v43 }
 0x174   : > { %v923_v44 = vpop.permute.xlu1 %922 }
 0x175   : > { %v972_v45 = vmul.f32 %v923_v44, %v1733_v10  ;;  %v994_v10 = vld [vmem:[%s1801_s8 + $0x68] sm:$0xff] }
 0x176   : > { %1417 = vmatmul.msk.f32.gmra.mxu3 %vm334_vm0, %v993_v56 }
 0x177   : > { %1395 = vmatmul.msk.f32.gmra.mxu2 %vm334_vm0, %v972_v45 }
 0x17c   : > { %v943_v57 = vpop.permute.xlu2 %942 }
 0x17d   : > { %v976_v58 = vmul.f32 %v943_v57, %v1752_v23 }
 0x17e   : > { %1418 = vmatmul.msk.f32.gmra.mxu3 %vm334_vm0, %v994_v10 }
 0x17f   : > { %1396 = vmatmul.msk.f32.gmra.mxu2 %vm334_vm0, %v973_v47 }
 0x184   : > { %v933_v50 = vpop.permute.xlu0 %932 }
 0x185   : > { %v974_v51 = vmul.f32 %v933_v50, %v1741_v48 }
 0x186   : > { %1419 = vmatmul.msk.f32.gmra.mxu3 %vm334_vm0, %v995_v29 }
 0x187   : > { %1397 = vmatmul.msk.f32.gmra.mxu2 %vm334_vm0, %v974_v51 }
 0x18c   : > { %v938_v54 = vpop.permute.xlu1 %937 }
 0x18d   : > { %v975_v55 = vmul.f32 %v938_v54, %v1745_v4 }
 0x18e   : > { %1420 = vmatmul.msk.f32.gmra.mxu3 %vm334_vm0, %v996_v59 }
 0x18f   : > { %1398 = vmatmul.msk.f32.gmra.mxu2 %vm334_vm0, %v975_v55 }
 0x191   : > { %v1192_v61 = vpop.f32.mrf.mxu3 }
 0x194   : > { %v958_v63 = vpop.permute.xlu2 %957 }
 0x195   : > { %v979_v23 = vmul.f32 %v958_v63, %v1820_v36 }
 0x197   : > { %1399 = vmatmul.msk.f32.gmra.mxu2 %vm334_vm0, %v976_v58 }
 0x199   : > { %v1195_v0 = vpop.f32.mrf.mxu3 }
 0x19c   : > { %v948_v48 = vpop.permute.xlu0 %947 }
 0x19d   : > { %v977_v60 = vmul.f32 %v948_v48, %v1781_v52 }
 0x19f   : > { %1400 = vmatmul.msk.f32.gmra.mxu2 %vm334_vm0, %v977_v60 }
 0x1a1   : > { %v1198_v5 = vpop.f32.mrf.mxu3 }
 0x1a4   : > { %v953_v4 = vpop.permute.xlu1 %952 }
 0x1a5   : > { %v978_v62 = vmul.f32 %v953_v4, %v1810_v13 }
 0x1a7   : > { %1401 = vmatmul.msk.f32.gmra.mxu2 %vm334_vm0, %v978_v62 }
 0x1a9   : > { %v1201_v52 = vpop.f32.mrf.mxu3 }
 0x1af   : > { %1402 = vmatmul.msk.f32.gmra.mxu2 %vm334_vm0, %v979_v23 }
 0x1b1   : > { %v1204_v8 = vpop.f32.mrf.mxu3 }
 0x1b4   : > { %v963_v1 = vpop.permute.xlu0 %962 }
 0x1b5   : > { %v980_v3 = vmul.f32 %v963_v1, %v1826_v53 }
 0x1b7   : > { %1403 = vmatmul.msk.f32.gmra.mxu2 %vm334_vm0, %v980_v3 }
 0x1c1   : > { %v1207_v15 = vpop.f32.mrf.mxu3 }
 0x1c2   : > { %v1076_v13 = vpop.f32.mrf.mxu2 }
 0x1c3   : > { %v1193_v7 = vadd.f32 %v1192_v61, %v1076_v13 }
 0x1c5   : > { %v1244_v36 = vadd.f32 %v1892_v6, %v1193_v7 }
 0x1c7   : > { %1260 = vst [vmem:[%s1898_s15] sm:$0xff] %v1244_v36 }
 0x1c9   : > { %v1210_v21 = vpop.f32.mrf.mxu3 }
 0x1ca   : > { %v1079_v53 = vpop.f32.mrf.mxu2 }
 0x1cb   : > { %v1196_v9 = vadd.f32 %v1195_v0, %v1079_v53 }
 0x1cd   : > { %v1245_v11 = vadd.f32 %v1892_v6, %v1196_v9 }
 0x1cf   : > { %1261 = vst [vmem:[%s1898_s15 + $0x8] sm:$0xff] %v1245_v11 }
 0x1d1   : > { %v1213_v26 = vpop.f32.mrf.mxu3 }
 0x1d2   : > { %v1082_v12 = vpop.f32.mrf.mxu2 }
 0x1d3   : > { %v1199_v14 = vadd.f32 %v1198_v5, %v1082_v12 }
 0x1d5   : > { %v1246_v16 = vadd.f32 %v1892_v6, %v1199_v14 }
 0x1d7   : > { %1262 = vst [vmem:[%s1898_s15 + $0x10] sm:$0xff] %v1246_v16 }
 0x1d9   : > { %v1216_v32 = vpop.f32.mrf.mxu3 }
 0x1da   : > { %v1085_v17 = vpop.f32.mrf.mxu2 }
 0x1db   : > { %v1202_v18 = vadd.f32 %v1201_v52, %v1085_v17 }
 0x1dd   : > { %v1247_v20 = vadd.f32 %v1892_v6, %v1202_v18 }
 0x1df   : > { %1263 = vst [vmem:[%s1898_s15 + $0x18] sm:$0xff] %v1247_v20 }
 0x1e1   : > { %v1219_v39 = vpop.f32.mrf.mxu3 }
 0x1e2   : > { %v1088_v22 = vpop.f32.mrf.mxu2 }
 0x1e3   : > { %v1205_v24 = vadd.f32 %v1204_v8, %v1088_v22 }
 0x1e5   : > { %v1248_v25 = vadd.f32 %v1892_v6, %v1205_v24 }
 0x1e7   : > { %1264 = vst [vmem:[%s1898_s15 + $0x20] sm:$0xff] %v1248_v25 }
 0x1e9   : > { %v1222_v42 = vpop.f32.mrf.mxu3 }
 0x1ea   : > { %v1091_v27 = vpop.f32.mrf.mxu2 }
 0x1eb   : > { %v1208_v28 = vadd.f32 %v1207_v15, %v1091_v27 }
 0x1ed   : > { %v1249_v30 = vadd.f32 %v1892_v6, %v1208_v28 }
 0x1ef   : > { %1265 = vst [vmem:[%s1898_s15 + $0x28] sm:$0xff] %v1249_v30 }
 0x1f1   : > { %v1225_v45 = vpop.f32.mrf.mxu3 }
 0x1f2   : > { %v1094_v31 = vpop.f32.mrf.mxu2 }
 0x1f3   : > { %v1211_v33 = vadd.f32 %v1210_v21, %v1094_v31 }
 0x1f5   : > { %v1250_v34 = vadd.f32 %v1892_v6, %v1211_v33 }
 0x1f7   : > { %1266 = vst [vmem:[%s1898_s15 + $0x30] sm:$0xff] %v1250_v34 }
 0x1f9   : > { %v1228_v50 = vpop.f32.mrf.mxu3 }
 0x1fa   : > { %v1097_v35 = vpop.f32.mrf.mxu2 }
 0x1fb   : > { %v1214_v37 = vadd.f32 %v1213_v26, %v1097_v35 }
 0x1fd   : > { %v1251_v49 = vadd.f32 %v1892_v6, %v1214_v37 }
 0x1ff   : > { %1267 = vst [vmem:[%s1898_s15 + $0x38] sm:$0xff] %v1251_v49 }
 0x201   : > { %v1231_v29 = vpop.f32.mrf.mxu3 }
 0x202   : > { %v1100_v40 = vpop.f32.mrf.mxu2 }
 0x203   : > { %v1217_v41 = vadd.f32 %v1216_v32, %v1100_v40 }
 0x205   : > { %v1252_v2 = vadd.f32 %v1892_v6, %v1217_v41 }
 0x207   : > { %1268 = vst [vmem:[%s1898_s15 + $0x40] sm:$0xff] %v1252_v2 }
 0x209   : > { %v1234_v60 = vpop.f32.mrf.mxu3 }
 0x20a   : > { %v1103_v43 = vpop.f32.mrf.mxu2 }
 0x20b   : > { %v1220_v19 = vadd.f32 %v1219_v39, %v1103_v43 }
 0x20d   : > { %v1253_v44 = vadd.f32 %v1892_v6, %v1220_v19 }
 0x20f   : > { %1269 = vst [vmem:[%s1898_s15 + $0x48] sm:$0xff] %v1253_v44 }
 0x211   : > { %v1237_v63 = vpop.f32.mrf.mxu3 }
 0x212   : > { %v1106_v38 = vpop.f32.mrf.mxu2 }
 0x213   : > { %v1223_v46 = vadd.f32 %v1222_v42, %v1106_v38 }
 0x215   : > { %v1254_v47 = vadd.f32 %v1892_v6, %v1223_v46 }
 0x217   : > { %1270 = vst [vmem:[%s1898_s15 + $0x50] sm:$0xff] %v1254_v47 }
 0x21a   : > { %v1109_v56 = vpop.f32.mrf.mxu2 }
 0x21b   : > { %v1226_v51 = vadd.f32 %v1225_v45, %v1109_v56 }
 0x21d   : > { %v1255_v10 = vadd.f32 %v1892_v6, %v1226_v51 }
 0x21f   : > { %1271 = vst [vmem:[%s1898_s15 + $0x58] sm:$0xff] %v1255_v10 }
 0x222   : > { %v1112_v54 = vpop.f32.mrf.mxu2 }
 0x223   : > { %v1229_v55 = vadd.f32 %v1228_v50, %v1112_v54 }
 0x225   : > { %v1256_v57 = vadd.f32 %v1892_v6, %v1229_v55 }
 0x227   : > { %1272 = vst [vmem:[%s1898_s15 + $0x60] sm:$0xff] %v1256_v57 }
 0x22a   : > { %v1115_v58 = vpop.f32.mrf.mxu2 }
 0x22b   : > { %v1232_v59 = vadd.f32 %v1231_v29, %v1115_v58 }
 0x22d   : > { %v1257_v48 = vadd.f32 %v1892_v6, %v1232_v59 }
 0x22f   : > { %1273 = vst [vmem:[%s1898_s15 + $0x68] sm:$0xff] %v1257_v48 }
 0x232   : > { %v1118_v61 = vpop.f32.mrf.mxu2 }
 0x233   : > { %v1235_v4 = vadd.f32 %v1234_v60, %v1118_v61 }
 0x235   : > { %v1258_v62 = vadd.f32 %v1892_v6, %v1235_v4 }
 0x237   : > { %1274 = vst [vmem:[%s1898_s15 + $0x70] sm:$0xff] %v1258_v62 }
 0x23a   : > { %v1121_v0 = vpop.f32.mrf.mxu2 }
 0x23b   : > { %v1238_v23 = vadd.f32 %v1237_v63, %v1121_v0 }
 0x23d   : > { %v1259_v1 = vadd.f32 %v1892_v6, %v1238_v23 }
 0x23f   : > { %1275 = vst [vmem:[%s1898_s15 + $0x78] sm:$0xff] %v1259_v1 }
 0x240 PF: > { %s16_s23 = sadd.s32 1, %s1508_s23   ;;  %s1948_s21 = smov %s1504_s22 }
 0x241   : > { %p13_p5 = scmp.ge.s32.totalorder %s16_s23, 4   ;;  %s1949_s22 = smov %s1951_s24 }
 0x243   :  { %15 = sbr.rel (!%p13_p5) target bundleno = 2 (0x2), region = 88 }

</bundles_post_ra>
